<compile_context>
chip_gen: v6e
topology: v6e:2x2x1
jax: 0.10.0
libtpu: 0.0.40
codegen_flags: <defaults>
</compile_context>

<pallas_src>
import functools

import jax
import jax.numpy as jnp
import numpy as np
from jax import lax
from jax.experimental import pallas as pl
from jax.experimental.pallas import tpu as pltpu

LANE = 128  # TPU lane width; hidden/output feature dims padded to this


def _round_up(x, m):
    return ((x + m - 1) // m) * m


# ----------------------------- Pallas kernel --------------------------------

def _siren_fused_kernel(*refs, num_layers, sub):
    """refs = (x_ref, w0, b0, w1, b1, ..., w_{L-1}, b_{L-1}, o_ref).

    Entire MLP for one row tile. The tile is processed in `sub`-row chunks so
    per-layer live values stay within the vreg file; matmuls run bf16 on the
    MXU with f32 accumulation, sin(y)^2 + y runs in f32 on the VPU.
    """
    x_ref = refs[0]
    o_ref = refs[-1]
    layer_refs = refs[1:-1]

    n_sub = x_ref.shape[0] // sub

    def sub_chunk(i, carry):
        r0 = pl.multiple_of(i * sub, sub)
        h = x_ref[pl.ds(r0, sub), :]                       # bf16 (sub, f_in_pad)
        for li in range(num_layers):
            w = layer_refs[2 * li][...]                    # bf16, VMEM-resident
            b = layer_refs[2 * li + 1][...]                # f32  (1, LANE)
            y = jnp.dot(h, w, preferred_element_type=jnp.float32) + b
            if li < num_layers - 1:                        # SineLayer activation
                s = jnp.sin(y)                             # f32 (fast path on v5e too)
                y = s * s + y                              # sin(y)^2 + y
                h = y.astype(jnp.bfloat16)                 # bf16 operand for next matmul
            else:
                h = y
        o_ref[pl.ds(r0, sub), :] = h.astype(o_ref.dtype)
        return carry

    lax.fori_loop(0, n_sub, sub_chunk, 0)


# ------------------------------ fused forward --------------------------------

def siren_forward(params, t, x, latent, *, row_tile=512):
    """Equivalent of Siren.forward(t, x): net(cat([x, latent], dim=1)).

    `t` is unused by the reference forward; kept for signature parity.
    The whole MLP runs inside a single pallas_call; only the concat, the
    zero-padding and the final slice/cast are plain-JAX glue.
    """
    del t
    h = jnp.concatenate([x, latent], axis=1).astype(jnp.float32)
    n, f_in = h.shape
    num_layers = len(params)
    out_feature = params[-1][0].shape[1]
    assert f_in <= LANE
    assert all(w.shape[0] <= LANE and w.shape[1] <= LANE for w, _ in params)

    # Pad the input feature dim only to the bf16 sublane pack (16), not 128.
    f_in_pad = max(16, _round_up(f_in, 16))

    # Row tile: large for HBM roofline / per-step overhead, >=2 grid steps when
    # possible so both v7x TensorCores get work; multiples of 16 for bf16 rows.
    if n >= 2 * row_tile:
        tn = row_tile
    elif n >= 256:
        tn = _round_up(-(-n // 2), 128)        # two grid steps, 128-row aligned
    else:
        tn = max(16, _round_up(n, 16))         # tiny batch: single small tile
    sub = 128 if tn % 128 == 0 else tn         # in-register sub-chunk size
    n_pad = _round_up(n, tn)

    # Input streamed at (near) true width in bf16 — tiny HBM traffic per row.
    x_p = jnp.zeros((n_pad, f_in_pad), jnp.bfloat16).at[:n, :f_in].set(
        h.astype(jnp.bfloat16))

    flat_params = []
    in_specs = [pl.BlockSpec((tn, f_in_pad), lambda i: (i, 0))]   # row-tiled x
    for li, (w, b) in enumerate(params):
        rows = f_in_pad if li == 0 else LANE
        w_p = jnp.zeros((rows, LANE), jnp.bfloat16).at[:w.shape[0], :w.shape[1]].set(
            w.astype(jnp.bfloat16))
        b_p = jnp.zeros((1, LANE), jnp.float32).at[:, :b.shape[1]].set(
            b.astype(jnp.float32))
        flat_params += [w_p, b_p]
        # constant block index -> weights/biases stay VMEM-resident across grid
        in_specs.append(pl.BlockSpec((rows, LANE), lambda i: (0, 0)))
        in_specs.append(pl.BlockSpec((1, LANE), lambda i: (0, 0)))

    kernel = functools.partial(_siren_fused_kernel, num_layers=num_layers, sub=sub)

    flops = 2 * n_pad * LANE * (f_in_pad + (num_layers - 1) * LANE)
    transcendentals = n_pad * LANE * (num_layers - 1)
    bytes_accessed = (2 * n_pad * (f_in_pad + LANE)                      # bf16 in/out
                      + 2 * (f_in_pad + (num_layers - 1) * LANE) * LANE  # bf16 weights
                      + 4 * num_layers * LANE)                           # f32 biases

    out = pl.pallas_call(
        kernel,
        out_shape=jax.ShapeDtypeStruct((n_pad, LANE), jnp.bfloat16),
        grid=(n_pad // tn,),
        in_specs=in_specs,
        out_specs=pl.BlockSpec((tn, LANE), lambda i: (i, 0)),
        compiler_params=pltpu.CompilerParams(
            dimension_semantics=("parallel",),   # rows independent (2 TCs on v7x)
        ),
        cost_estimate=pl.CostEstimate(
            flops=flops,
            transcendentals=transcendentals,
            bytes_accessed=bytes_accessed,
        ),
    )(x_p, *flat_params)

    return out[:n, :out_feature].astype(jnp.float32)


# --------------------------- parameter construction -------------------------

def init_siren_params(key, in_feature, latent_dim, hidden_dim, hidden_layers,
                      out_feature, first_omega_0=30.0, hidden_omega_0=30.0,
                      dtype=jnp.float32):
    """Deterministic init matching the PyTorch module's init ranges.

    Weight ranges:
      first layer : U(-1/in, 1/in)
      hidden/final: U(-sqrt(6/in)/omega_0, sqrt(6/in)/omega_0)
    Bias keeps PyTorch nn.Linear default: U(-1/sqrt(in), 1/sqrt(in)).
    Weights stored as [F_in, F_out] (transposed vs torch)."""
    in_features = in_feature + latent_dim
    dims = [in_features] + [hidden_dim] * (hidden_layers + 1) + [out_feature]
    params = []
    for li in range(len(dims) - 1):
        f_in, f_out = dims[li], dims[li + 1]
        key, kw, kb = jax.random.split(key, 3)
        if li == 0:
            bound = 1.0 / f_in
        else:
            bound = np.sqrt(6.0 / f_in) / hidden_omega_0
        w = jax.random.uniform(kw, (f_in, f_out), dtype, -bound, bound)
        b_bound = 1.0 / np.sqrt(f_in)
        b = jax.random.uniform(kb, (1, f_out), dtype, -b_bound, b_bound)
        params.append((w, b))
    return params


# --------------------------------- main --------------------------------------

if __name__ == "__main__":
    # Small config consistent with the module's args.model dict.
    in_feature, latent_dim = 2, 2
    hidden_dim, hidden_layers, out_feature = 32, 2, 3
    batch = 8

    key = jax.random.PRNGKey(0)
    kp, kx, kl, kt = jax.random.split(key, 4)

    params = init_siren_params(kp, in_feature, latent_dim, hidden_dim,
                               hidden_layers, out_feature)

    x = jax.random.normal(kx, (batch, in_feature), jnp.float32)
    latent = jax.random.normal(kl, (batch, latent_dim), jnp.float32)
    t = jax.random.normal(kt, (batch, 1), jnp.float32)   # unused, matches API

    out = siren_forward(params, t, x, latent)
    jax.block_until_ready(out)

    # sanity check vs. a pure-JAX reference using the same bf16-operand /
    # f32-accumulate matmuls (tolerance accounts for the bf16 output round)
    hb = jnp.concatenate([x, latent], axis=1).astype(jnp.bfloat16)
    ref = None
    for li, (w, b) in enumerate(params):
        y = jnp.dot(hb, w.astype(jnp.bfloat16),
                    preferred_element_type=jnp.float32) + b
        if li < len(params) - 1:
            y = jnp.sin(y) ** 2 + y
            hb = y.astype(jnp.bfloat16)
        else:
            ref = y
    np.testing.assert_allclose(np.asarray(out), np.asarray(ref),
                               rtol=2e-2, atol=2e-2)

    assert out.shape == (batch, out_feature)
    print("KERNEL_OK")
</pallas_src>

<mosaic_0001>
module attributes {stable_mosaic.version = 11 : i64} {
  func.func @_siren_fused_kernel(%arg0: i32, %arg1: memref<16x16xbf16, #tpu.memory_space<vmem>>, %arg2: memref<16x128xbf16, #tpu.memory_space<vmem>>, %arg3: memref<1x128xf32, #tpu.memory_space<vmem>>, %arg4: memref<128x128xbf16, #tpu.memory_space<vmem>>, %arg5: memref<1x128xf32, #tpu.memory_space<vmem>>, %arg6: memref<128x128xbf16, #tpu.memory_space<vmem>>, %arg7: memref<1x128xf32, #tpu.memory_space<vmem>>, %arg8: memref<128x128xbf16, #tpu.memory_space<vmem>>, %arg9: memref<1x128xf32, #tpu.memory_space<vmem>>, %arg10: memref<16x128xbf16, #tpu.memory_space<vmem>>) attributes {dimension_semantics = [#tpu.dimension_semantics<parallel>], iteration_bounds = array<i64: 1>, scalar_prefetch = 0 : i64, scratch_operands = 0 : i64, tpu.core_type = #tpu.core_type<tc>, window_params = [{transform_indices = @transform_0, window_bounds = array<i64: 16, 16>}, {pipeline_mode = #tpu.pipeline_mode<synchronous>, transform_indices = @transform_1, window_bounds = array<i64: 16, 128>}, {pipeline_mode = #tpu.pipeline_mode<synchronous>, transform_indices = @transform_2, window_bounds = array<i64: 1, 128>}, {pipeline_mode = #tpu.pipeline_mode<synchronous>, transform_indices = @transform_3, window_bounds = array<i64: 128, 128>}, {pipeline_mode = #tpu.pipeline_mode<synchronous>, transform_indices = @transform_4, window_bounds = array<i64: 1, 128>}, {pipeline_mode = #tpu.pipeline_mode<synchronous>, transform_indices = @transform_5, window_bounds = array<i64: 128, 128>}, {pipeline_mode = #tpu.pipeline_mode<synchronous>, transform_indices = @transform_6, window_bounds = array<i64: 1, 128>}, {pipeline_mode = #tpu.pipeline_mode<synchronous>, transform_indices = @transform_7, window_bounds = array<i64: 128, 128>}, {pipeline_mode = #tpu.pipeline_mode<synchronous>, transform_indices = @transform_8, window_bounds = array<i64: 1, 128>}, {transform_indices = @transform_9, window_bounds = array<i64: 16, 128>}]} {
    %c0_i32 = arith.constant 0 : i32
    %c16_i32 = arith.constant 16 : i32
    %0 = arith.muli %c0_i32, %c16_i32 : i32
    %1 = tpu.assume_multiple %0, 16 : i32
    %2 = arith.index_cast %1 : i32 to index
    %c0 = arith.constant 0 : index
    %3 = vector.load %arg1[%2, %c0] : memref<16x16xbf16, #tpu.memory_space<vmem>>, vector<16x16xbf16>
    %c0_0 = arith.constant 0 : index
    %c0_1 = arith.constant 0 : index
    %4 = vector.load %arg2[%c0_0, %c0_1] : memref<16x128xbf16, #tpu.memory_space<vmem>>, vector<16x128xbf16>
    %c0_2 = arith.constant 0 : index
    %c0_3 = arith.constant 0 : index
    %5 = vector.load %arg3[%c0_2, %c0_3] : memref<1x128xf32, #tpu.memory_space<vmem>>, vector<1x128xf32>
    %cst = arith.constant dense<0.000000e+00> : vector<16x128xf32>
    %6 = tpu.matmul %3, %4, %cst {dimension_numbers = #tpu.dot_dimension_numbers<[1], [0], [0], [1], [0, 0, 1, 1], [], []>} : vector<16x16xbf16>, vector<16x128xbf16>, vector<16x128xf32> -> vector<16x128xf32>
    %7 = vector.broadcast %5 : vector<1x128xf32> to vector<16x128xf32>
    %8 = arith.addf %6, %7 : vector<16x128xf32>
    %9 = math.sin %8 : vector<16x128xf32>
    %10 = arith.mulf %9, %9 : vector<16x128xf32>
    %11 = arith.addf %10, %8 : vector<16x128xf32>
    %12 = arith.truncf %11 : vector<16x128xf32> to vector<16x128xbf16>
    %c0_4 = arith.constant 0 : index
    %c0_5 = arith.constant 0 : index
    %13 = vector.load %arg4[%c0_4, %c0_5] : memref<128x128xbf16, #tpu.memory_space<vmem>>, vector<128x128xbf16>
    %c0_6 = arith.constant 0 : index
    %c0_7 = arith.constant 0 : index
    %14 = vector.load %arg5[%c0_6, %c0_7] : memref<1x128xf32, #tpu.memory_space<vmem>>, vector<1x128xf32>
    %cst_8 = arith.constant dense<0.000000e+00> : vector<16x128xf32>
    %15 = tpu.matmul %12, %13, %cst_8 {dimension_numbers = #tpu.dot_dimension_numbers<[1], [0], [0], [1], [0, 0, 1, 1], [], []>} : vector<16x128xbf16>, vector<128x128xbf16>, vector<16x128xf32> -> vector<16x128xf32>
    %16 = vector.broadcast %14 : vector<1x128xf32> to vector<16x128xf32>
    %17 = arith.addf %15, %16 : vector<16x128xf32>
    %18 = math.sin %17 : vector<16x128xf32>
    %19 = arith.mulf %18, %18 : vector<16x128xf32>
    %20 = arith.addf %19, %17 : vector<16x128xf32>
    %21 = arith.truncf %20 : vector<16x128xf32> to vector<16x128xbf16>
    %c0_9 = arith.constant 0 : index
    %c0_10 = arith.constant 0 : index
    %22 = vector.load %arg6[%c0_9, %c0_10] : memref<128x128xbf16, #tpu.memory_space<vmem>>, vector<128x128xbf16>
    %c0_11 = arith.constant 0 : index
    %c0_12 = arith.constant 0 : index
    %23 = vector.load %arg7[%c0_11, %c0_12] : memref<1x128xf32, #tpu.memory_space<vmem>>, vector<1x128xf32>
    %cst_13 = arith.constant dense<0.000000e+00> : vector<16x128xf32>
    %24 = tpu.matmul %21, %22, %cst_13 {dimension_numbers = #tpu.dot_dimension_numbers<[1], [0], [0], [1], [0, 0, 1, 1], [], []>} : vector<16x128xbf16>, vector<128x128xbf16>, vector<16x128xf32> -> vector<16x128xf32>
    %25 = vector.broadcast %23 : vector<1x128xf32> to vector<16x128xf32>
    %26 = arith.addf %24, %25 : vector<16x128xf32>
    %27 = math.sin %26 : vector<16x128xf32>
    %28 = arith.mulf %27, %27 : vector<16x128xf32>
    %29 = arith.addf %28, %26 : vector<16x128xf32>
    %30 = arith.truncf %29 : vector<16x128xf32> to vector<16x128xbf16>
    %c0_14 = arith.constant 0 : index
    %c0_15 = arith.constant 0 : index
    %31 = vector.load %arg8[%c0_14, %c0_15] : memref<128x128xbf16, #tpu.memory_space<vmem>>, vector<128x128xbf16>
    %c0_16 = arith.constant 0 : index
    %c0_17 = arith.constant 0 : index
    %32 = vector.load %arg9[%c0_16, %c0_17] : memref<1x128xf32, #tpu.memory_space<vmem>>, vector<1x128xf32>
    %cst_18 = arith.constant dense<0.000000e+00> : vector<16x128xf32>
    %33 = tpu.matmul %30, %31, %cst_18 {dimension_numbers = #tpu.dot_dimension_numbers<[1], [0], [0], [1], [0, 0, 1, 1], [], []>} : vector<16x128xbf16>, vector<128x128xbf16>, vector<16x128xf32> -> vector<16x128xf32>
    %34 = vector.broadcast %32 : vector<1x128xf32> to vector<16x128xf32>
    %35 = arith.addf %33, %34 : vector<16x128xf32>
    %36 = arith.truncf %35 : vector<16x128xf32> to vector<16x128xbf16>
    %37 = arith.index_cast %1 : i32 to index
    %c0_19 = arith.constant 0 : index
    %38 = vector.load %arg10[%37, %c0_19] : memref<16x128xbf16, #tpu.memory_space<vmem>>, vector<16x128xbf16>
    tpu.vector_store %arg10[%37, %c0_19], %36 {strides = array<i32>} : memref<16x128xbf16, #tpu.memory_space<vmem>>, vector<16x128xbf16>,
    %c1_i32 = arith.constant 1 : i32
    return
  }
  func.func @transform_0(%arg0: i32) -> (i32, i32) {
    %c0_i32 = arith.constant 0 : i32
    %c0_i32_0 = arith.constant 0 : i32
    return %arg0, %c0_i32 : i32, i32
  }
  func.func @transform_1(%arg0: i32) -> (i32, i32) {
    %c0_i32 = arith.constant 0 : i32
    %c0_i32_0 = arith.constant 0 : i32
    %c0_i32_1 = arith.constant 0 : i32
    return %c0_i32, %c0_i32_0 : i32, i32
  }
  func.func @transform_2(%arg0: i32) -> (i32, i32) {
    %c0_i32 = arith.constant 0 : i32
    %c0_i32_0 = arith.constant 0 : i32
    %c0_i32_1 = arith.constant 0 : i32
    return %c0_i32, %c0_i32_0 : i32, i32
  }
  func.func @transform_3(%arg0: i32) -> (i32, i32) {
    %c0_i32 = arith.constant 0 : i32
    %c0_i32_0 = arith.constant 0 : i32
    %c0_i32_1 = arith.constant 0 : i32
    return %c0_i32, %c0_i32_0 : i32, i32
  }
  func.func @transform_4(%arg0: i32) -> (i32, i32) {
    %c0_i32 = arith.constant 0 : i32
    %c0_i32_0 = arith.constant 0 : i32
    %c0_i32_1 = arith.constant 0 : i32
    return %c0_i32, %c0_i32_0 : i32, i32
  }
  func.func @transform_5(%arg0: i32) -> (i32, i32) {
    %c0_i32 = arith.constant 0 : i32
    %c0_i32_0 = arith.constant 0 : i32
    %c0_i32_1 = arith.constant 0 : i32
    return %c0_i32, %c0_i32_0 : i32, i32
  }
  func.func @transform_6(%arg0: i32) -> (i32, i32) {
    %c0_i32 = arith.constant 0 : i32
    %c0_i32_0 = arith.constant 0 : i32
    %c0_i32_1 = arith.constant 0 : i32
    return %c0_i32, %c0_i32_0 : i32, i32
  }
  func.func @transform_7(%arg0: i32) -> (i32, i32) {
    %c0_i32 = arith.constant 0 : i32
    %c0_i32_0 = arith.constant 0 : i32
    %c0_i32_1 = arith.constant 0 : i32
    return %c0_i32, %c0_i32_0 : i32, i32
  }
  func.func @transform_8(%arg0: i32) -> (i32, i32) {
    %c0_i32 = arith.constant 0 : i32
    %c0_i32_0 = arith.constant 0 : i32
    %c0_i32_1 = arith.constant 0 : i32
    return %c0_i32, %c0_i32_0 : i32, i32
  }
  func.func @transform_9(%arg0: i32) -> (i32, i32) {
    %c0_i32 = arith.constant 0 : i32
    %c0_i32_0 = arith.constant 0 : i32
    return %arg0, %c0_i32 : i32, i32
  }
}

</mosaic_0001>

<bundles_post_ra>
// kernel: tpu_custom_call.1
= control target key start
LH: loop header
LB: loop body
LE: loop exit
PB: predicated region body
PF: predicated region fallthrough
CT: control target
= control target key end

     0   :  { %14 = vsyncpa [#allocation3], 0  ;;  %s1970_s0 = inlined_call_operand.hbm [shape: bf16[16,16], index: 0, kind: input, shape index: {}]   ;;  %s1971_s1 = inlined_call_operand.hbm [shape: bf16[16,128], index: 1, kind: input, shape index: {}]   ;;  %s1972_s2 = inlined_call_operand.vmem [shape: f32[1,128], index: 2, kind: input, shape index: {}]   ;;  %s1973_s3 = inlined_call_operand.hbm [shape: bf16[128,128], index: 3, kind: input, shape index: {}]   ;;  %s1974_s4 = inlined_call_operand.vmem [shape: f32[1,128], index: 4, kind: input, shape index: {}]   ;;  %s1975_s5 = inlined_call_operand.hbm [shape: bf16[128,128], index: 5, kind: input, shape index: {}]   ;;  %s1976_s6 = inlined_call_operand.vmem [shape: f32[1,128], index: 6, kind: input, shape index: {}]   ;;  %s1977_s7 = inlined_call_operand.hbm [shape: bf16[128,128], index: 7, kind: input, shape index: {}]   ;;  %s1978_s8 = inlined_call_operand.vmem [shape: f32[1,128], index: 8, kind: input, shape index: {}]   ;;  %s1979_s9 = inlined_call_operand.hbm [shape: bf16[16,128], index: 9, kind: output, shape index: {}]  }
   0x1   :  { %15 = vsyncpa [#allocation6], 0 }
   0x2   :  { %16 = vsyncpa [#allocation9], 0 }
   0x3   :  { %17 = vsyncpa [#allocation4], 0  ;;  %s1550_s30 = smov [#allocation5]   ;;  %s1551_s11 = smov [#allocation8]  }
   0x4   :  { %s35_s10 = sshll.u32 %s1550_s30, 4  ;;  %s63_s12 = sshll.u32 %s1551_s11, 4  ;;  %s36_s10 = int_to_ptr.vmem [resolvable:$true] %s35_s10  ;;  %s64_s12 = int_to_ptr.vmem [resolvable:$true] %s63_s12 }
   0x5   :  { %s1430_s13 = scalar_lea.vmem %s36_s10, 128  ;;  %p1435_p1 = scmp.lt.s32.totalorder %s36_s10, %s36_s10 }
   0x6   :  { %p1431_p0 = scmp.ne.s32.totalorder %s36_s10, %s1430_s13  ;;  %p1436_p2 = scmp.lt.s32.totalorder %s1430_s13, %s1430_s13 }
   0x8   :  { %p1437_p3 = por %p1436_p2, %p1435_p1 }
   0xa   :  { %p1438_p4 = pnand %p1437_p3, %p1431_p0 }
   0xc   :  { %1441 = shalt.err (!%p1438_p4)
}
   0xd   :  { %s1552_s14 = smov 64   ;;  %s1553_s15 = smov 4  }
   0xe   :  { %41 = dma.hbm_to_vmem [thread:$0]  %s1971_s1, 128, %s36_s10, [#allocation6], %s1552_s14, %s1552_s14, %s1553_s15  }
   0xf   :  { %s1450_s18 = scalar_lea.vmem %s64_s12, 1024  ;;  %p1455_p6 = scmp.lt.s32.totalorder %s64_s12, %s64_s12 }
  0x10   :  { %p1451_p5 = scmp.ne.s32.totalorder %s64_s12, %s1450_s18  ;;  %p1456_p7 = scmp.lt.s32.totalorder %s1450_s18, %s1450_s18 }
  0x12   :  { %p1457_p8 = por %p1456_p7, %p1455_p6 }
  0x14   :  { %p1458_p9 = pnand %p1457_p8, %p1451_p5 }
  0x16   :  { %1461 = shalt.err (!%p1458_p9)
}
  0x17   :  { %69 = dma.hbm_to_vmem [thread:$0]  %s1975_s5, 1024, %s64_s12, [#allocation9], %s1552_s14, %s1552_s14, %s1553_s15  }
  0x18   :  { %s1554_s21 = smov [#allocation2]   ;;  %s1555_s23 = smov [#allocation7]  }
  0x19   :  { %s23_s22 = sshll.u32 %s1554_s21, 4  ;;  %s49_s24 = sshll.u32 %s1555_s23, 4  ;;  %s24_s22 = int_to_ptr.vmem [resolvable:$true] %s23_s22  ;;  %s50_s24 = int_to_ptr.vmem [resolvable:$true] %s49_s24 }
  0x1a   :  { %s1470_s1 = scalar_lea.vmem %s24_s22, 128  ;;  %p1475_p11 = scmp.lt.s32.totalorder %s24_s22, %s24_s22 }
  0x1b   :  { %p1471_p10 = scmp.ne.s32.totalorder %s24_s22, %s1470_s1  ;;  %p1476_p12 = scmp.lt.s32.totalorder %s1470_s1, %s1470_s1 }
  0x1d   :  { %p1477_p13 = por %p1476_p12, %p1475_p11 }
  0x1f   :  { %p1478_p0 = pnand %p1477_p13, %p1471_p10 }
  0x21   :  { %1481 = shalt.err (!%p1478_p0)
}
  0x22   :  { %29 = dma.hbm_to_vmem [thread:$0]  %s1970_s0, 128, %s24_s22, [#allocation3], %s1552_s14, %s1552_s14, %s1553_s15  }
  0x23   :  { %s1490_s5 = scalar_lea.vmem %s50_s24, 1024  ;;  %p1495_p2 = scmp.lt.s32.totalorder %s50_s24, %s50_s24 }
  0x24   :  { %p1491_p1 = scmp.ne.s32.totalorder %s50_s24, %s1490_s5  ;;  %p1496_p3 = scmp.lt.s32.totalorder %s1490_s5, %s1490_s5 }
  0x26   :  { %p1497_p4 = por %p1496_p3, %p1495_p2 }
  0x28   :  { %p1498_p5 = pnand %p1497_p4, %p1491_p1 }
  0x2a   :  { %1501 = shalt.err (!%p1498_p5)
}
  0x2b   :  { %55 = dma.hbm_to_vmem [thread:$0]  %s1973_s3, 1024, %s50_s24, [#allocation6], %s1552_s14, %s1552_s14, %s1553_s15  }
  0x2c   :  { %s1556_s29 = smov [#allocation10]  }
  0x2d   :  { %s77_s30 = sshll.u32 %s1556_s29, 4  ;;  %s78_s30 = int_to_ptr.vmem [resolvable:$true] %s77_s30 }
  0x2e   :  { %s1510_s10 = scalar_lea.vmem %s78_s30, 1024  ;;  %p1515_p7 = scmp.lt.s32.totalorder %s78_s30, %s78_s30 }
  0x2f   :  { %p1511_p6 = scmp.ne.s32.totalorder %s78_s30, %s1510_s10  ;;  %p1516_p8 = scmp.lt.s32.totalorder %s1510_s10, %s1510_s10 }
  0x31   :  { %p1517_p9 = por %p1516_p8, %p1515_p7 }
  0x33   :  { %p1518_p10 = pnand %p1517_p9, %p1511_p6 }
  0x35   :  { %1521 = shalt.err (!%p1518_p10)
}
  0x36   :  { %83 = dma.hbm_to_vmem [thread:$0]  %s1977_s7, 1024, %s78_s30, [#allocation9], %s1552_s14, %s1552_s14, %s1553_s15  }
  0x37   :  { %1542 = dma.done.wait [#allocation3], 128  }
  0x38   :  { %1543 = vsyncadd [#allocation3], 4294967168 }
  0x39   :  { %1544 = dma.done.wait [#allocation6], 1152  }
  0x3a   :  { %1545 = vsyncadd [#allocation6], 4294966144 }
  0x3b   :  { %1546 = dma.done.wait [#allocation9], 2048  }
  0x3c   :  { %1547 = vsyncadd [#allocation9], 4294965248  ;;  %v1557_v0 = vmov 0.0   ;;  %vm1558_vm0 = vmmov 0   ;;  %v1372_v1 = vld [vmem:[#allocation5] sm:$0xff]   ;;  %v1373_v2 = vld [vmem:[#allocation2] sm:$0xff]  }
  0x3d   :  { %1266 = vmatprep.subr.bf16.mxu0 %v1557_v0  ;;  %1268 = vmatprep.mubr.msk.bf16.mxu0 %vm1558_vm0, %v1557_v0  ;;  %vm124_vm1 = vcmask 130048   ;;  %v1374_v3 = vld [vmem:[#allocation7 + $0x38] sm:$0xff]   ;;  %v1375_v4 = vld [vmem:[#allocation7 + $0x30] sm:$0xff]   ;;  %v1376_v5 = vld [vmem:[#allocation7 + $0x28] sm:$0xff]   ;;  %v1559_v34 = vmov 683565275  }
  0x3e   :  { %1272 = vmatprep.subr.bf16.mxu1 %v1557_v0  ;;  %1288 = vmatprep.mubr.msk.bf16.mxu1 %vm1558_vm0, %v1557_v0  ;;  %v1377_v6 = vld [vmem:[#allocation7 + $0x20] sm:$0xff]   ;;  %v1378_v7 = vld [vmem:[#allocation7 + $0x18] sm:$0xff]   ;;  %v1379_v8 = vld [vmem:[#allocation7 + $0x10] sm:$0xff]   ;;  %v1560_v38 = vmov 2475754826   ;;  %s1565_s17 = smov [#allocation11]  }
  0x3f   :  { %1267 = vmatpush3.bf16.msra.mxu0 %v1372_v1  ;;  %1273 = vmatpush3.bf16.msra.mxu1 %v1374_v3  ;;  %v1380_v9 = vld [vmem:[#allocation7 + $0x8] sm:$0xff]   ;;  %v1381_v10 = vld [vmem:[#allocation7] sm:$0xff]   ;;  %v1173_v11 = vld [vmem:[%s1972_s2] ss:$0 sm:$0xff]  ;;  %v1561_v40 = vmov 2131351028  }
  0x40   :  { %1292 = vmatprep.subr.bf16.mxu0 %v1557_v0  ;;  %1274 = vmatprep.subr.bf16.mxu1 %v1557_v0  ;;  %v1562_v42 = vmov 2102212464   ;;  %v1563_v44 = vmov 920167782   ;;  %v1564_v51 = vmov 1326507024  }
  0x41   :  { %s1159_s18 = sshll.u32 %s1565_s17, 4  ;;  %s1160_s18 = int_to_ptr.vmem [resolvable:$true] %s1159_s18 }
  0x42   :  { %1269 = vmatmul.mubr.msk.bf16.vlgmr.msra.gmra.mxu0 %vm124_vm1, %v1373_v2  ;;  %s1522_s19 = scalar_lea.vmem %s1160_s18, 128  ;;  %p1527_p12 = scmp.lt.s32.totalorder %s1160_s18, %s1160_s18 }
  0x43   :  { %1308 = vmatprep.mubr.msk.bf16.mxu0 %vm1558_vm0, %v1557_v0  ;;  %1275 = vmatpush3.bf16.msra.mxu1 %v1375_v4  ;;  %p1523_p11 = scmp.ne.s32.totalorder %s1160_s18, %s1522_s19  ;;  %p1528_p13 = scmp.lt.s32.totalorder %s1522_s19, %s1522_s19 }
  0x44   :  { %1276 = vmatprep.subr.bf16.mxu1 %v1557_v0 }
  0x45   :  { %p1529_p0 = por %p1528_p13, %p1527_p12 }
  0x47   :  { %1277 = vmatpush3.bf16.msra.mxu1 %v1376_v5  ;;  %p1530_p1 = pnand %p1529_p0, %p1523_p11 }
  0x48   :  { %1278 = vmatprep.subr.bf16.mxu1 %v1557_v0 }
  0x4b   :  { %1279 = vmatpush3.bf16.msra.mxu1 %v1377_v6 }
  0x4c   :  { %1280 = vmatprep.subr.bf16.mxu1 %v1557_v0 }
  0x4f   :  { %1281 = vmatpush3.bf16.msra.mxu1 %v1378_v7 }
  0x50   :  { %1282 = vmatprep.subr.bf16.mxu1 %v1557_v0 }
  0x53   :  { %1283 = vmatpush3.bf16.msra.mxu1 %v1379_v8 }
  0x54   :  { %1284 = vmatprep.subr.bf16.mxu1 %v1557_v0 }
  0x57   :  { %1285 = vmatpush3.bf16.msra.mxu1 %v1380_v9 }
  0x58   :  { %1286 = vmatprep.subr.bf16.mxu1 %v1557_v0 }
  0x5b   :  { %1287 = vmatpush3.bf16.msra.mxu1 %v1381_v10 }
  0x5c   :  { %1312 = vmatprep.subr.bf16.mxu1 %v1557_v0 }
 0x102   :  { %v162_v12 = vpop.f32.mrf.mxu0 }
 0x103   :  { %v1666_v13 = vadd.f32 %v1173_v11, %v162_v12 }
 0x104   :  { %v1270_v14 = vpop.f32.mrf.mxu0 }
 0x105   :  { %v169_v15 = vand.u32 2147483647, %v1666_v13  ;;  %v172_v16 = vand.u32 2139095040, %v1666_v13  ;;  %vm171_vm1 = vcmp.lt.s32.totalorder %v1666_v13, 0 }
 0x106   :  { %v165_v17 = vpop.f32.mrf.mxu0 }
 0x107   :  { %v173_v18 = vshrl.u32 %v172_v16, 23  ;;  %v1670_v19 = vadd.f32 %v1173_v11, %v165_v17  ;;  %v176_v20 = vand.u32 8388607, %v169_v15 }
 0x108   :  { %v1271_v21 = vpop.f32.mrf.mxu0 }
 0x109   :  { %v1177_v22 = vadd.s32 4294967169, %v173_v18  ;;  %v276_v23 = vand.u32 2139095040, %v1670_v19  ;;  %v177_v25 = vor.u32 8388608, %v176_v20  ;;  %v273_v27 = vand.u32 2147483647, %v1670_v19 }
 0x10b   :  { %v179_v24 = vadd.s32 1, %v1177_v22  ;;  %v277_v26 = vshrl.u32 %v276_v23, 23  ;;  %v1676_v32 = vshll.u32 %v177_v25, 8  ;;  %v280_v36 = vand.u32 8388607, %v273_v27 }
 0x10d   :  { %vm180_vm2 = vcmp.gt.s32.totalorder %v179_v24, 0  ;;  %v1181_v29 = vadd.s32 4294967169, %v277_v26  ;;  %v281_v3 = vor.u32 8388608, %v280_v36 }
 0x10e   :  { %v181_v28 = vsel %vm180_vm2, %v179_v24, 0  ;;  %vm1742_vm2 = vcmp.le.f32.partialorder %v169_v15, 0.7853982 }
 0x10f   :  { %v182_v30 = vshrl.u32 %v181_v28, 5  ;;  %v183_v31 = vand.u32 31, %v181_v28  ;;  %v283_v37 = vadd.s32 1, %v1181_v29  ;;  %v321_v18 = vshll.u32 %v281_v3, 8 }
 0x111   :  { %v184_v33 = vsub.s32 32, %v183_v31  ;;  %v186_v35 = vshll.u32 %v1559_v34, %v183_v31  ;;  %v189_v39 = vshll.u32 %v1560_v38, %v183_v31  ;;  %v192_v41 = vshll.u32 %v1561_v40, %v183_v31 }
 0x112   :  { %v195_v43 = vshll.u32 %v1562_v42, %v183_v31  ;;  %v198_v45 = vshll.u32 %v1563_v44, %v183_v31  ;;  %vm201_vm3 = vcmp.lt.s32.totalorder %v182_v30, 1  ;;  %vm203_vm4 = vcmp.lt.s32.totalorder %v182_v30, 3 }
 0x113   :  { %v187_v46 = vshrl.u32 %v1560_v38, %v184_v33  ;;  %v190_v47 = vshrl.u32 %v1561_v40, %v184_v33  ;;  %v193_v48 = vshrl.u32 %v1562_v42, %v184_v33  ;;  %v185_v49 = vshrl.u32 %v1559_v34, %v184_v33 }
 0x114   :  { %v196_v50 = vshrl.u32 %v1563_v44, %v184_v33  ;;  %v199_v52 = vshrl.u32 %v1564_v51, %v184_v33  ;;  %vm284_vm5 = vcmp.gt.s32.totalorder %v283_v37, 0  ;;  %vm204_vm6 = vcmp.lt.s32.totalorder %v182_v30, 4 }
 0x115   :  { %v188_v53 = vor.u32 %v187_v46, %v186_v35  ;;  %v191_v54 = vor.u32 %v190_v47, %v189_v39  ;;  %v194_v55 = vor.u32 %v193_v48, %v192_v41  ;;  %v285_v58 = vsel %vm284_vm5, %v283_v37, 0 }
 0x116   :  { %v197_v56 = vor.u32 %v196_v50, %v195_v43  ;;  %v200_v57 = vor.u32 %v199_v52, %v198_v45  ;;  %vm202_vm7 = vcmp.lt.s32.totalorder %v182_v30, 2  ;;  %v287_v6 = vand.u32 31, %v285_v58 }
 0x117   :  { %v205_v59 = vsel %vm201_vm3, %v185_v49, %v188_v53  ;;  %v206_v60 = vsel %vm204_vm6, %v194_v55, 2102212464  ;;  %v209_v61 = vsel %vm201_vm3, %v188_v53, %v191_v54  ;;  %v213_v62 = vsel %vm201_vm3, %v191_v54, %v194_v55 }
 0x118   :  { %v207_v63 = vsel %vm203_vm4, %v191_v54, %v206_v60  ;;  %v210_v1 = vsel %vm204_vm6, %v197_v56, 920167782  ;;  %v214_v2 = vsel %vm204_vm6, %v200_v57, 1326507024  ;;  %v286_v16 = vshrl.u32 %v285_v58, 5 }
 0x119   :  { %v211_v4 = vsel %vm203_vm4, %v194_v55, %v210_v1  ;;  %v215_v5 = vsel %vm203_vm4, %v197_v56, %v214_v2  ;;  %v208_v7 = vsel %vm202_vm7, %v205_v59, %v207_v63  ;;  %v288_v17 = vsub.s32 32, %v287_v6 }
 0x11a   :  { %v212_v8 = vsel %vm202_vm7, %v209_v61, %v211_v4  ;;  %v216_v9 = vsel %vm202_vm7, %v213_v62, %v215_v5  ;;  %v224_v20 = vmul.u32 %v1676_v32, %v208_v7  ;;  %v290_v21 = vshll.u32 %v1559_v34, %v287_v6 }
 0x11b   :  { %v1698_v10 = vmul.u32.u64.low %v1676_v32, %v216_v9  ;;  %v1699_v11 = vmul.u32.u64.high %v1676_v32, %v216_v9, %v1698_v10  ;;  %v1702_v12 = vmul.u32.u64.low %v1676_v32, %v212_v8  ;;  %v1703_v14 = vmul.u32.u64.high %v1676_v32, %v212_v8, %v1702_v12 }
 0x11c   :  { %v293_v22 = vshll.u32 %v1560_v38, %v287_v6  ;;  %v296_v23 = vshll.u32 %v1561_v40, %v287_v6  ;;  %v291_v24 = vshrl.u32 %v1560_v38, %v288_v17  ;;  %v294_v25 = vshrl.u32 %v1561_v40, %v288_v17 }
 0x11d   :  { %v297_v26 = vshrl.u32 %v1562_v42, %v288_v17  ;;  %v299_v28 = vshll.u32 %v1562_v42, %v287_v6  ;;  %vm226_vm8 = vc.u32 %v1699_v11, %v1702_v12  ;;  %v227_v29 = vadd.s32 1, %v1703_v14 }
 0x11e   :  { %v300_v30 = vshrl.u32 %v1563_v44, %v288_v17  ;;  %v302_v31 = vshll.u32 %v1563_v44, %v287_v6  ;;  %v292_v32 = vor.u32 %v291_v24, %v290_v21  ;;  %v295_v33 = vor.u32 %v294_v25, %v293_v22 }
 0x11f   :  { %v298_v35 = vor.u32 %v297_v26, %v296_v23  ;;  %v303_v36 = vshrl.u32 %v1564_v51, %v288_v17  ;;  %v228_v37 = vsel %vm226_vm8, %v227_v29, %v1703_v14  ;;  %vm305_vm9 = vcmp.lt.s32.totalorder %v286_v16, 1 }
 0x120   :  { %v301_v39 = vor.u32 %v300_v30, %v299_v28  ;;  %vm308_vm10 = vcmp.lt.s32.totalorder %v286_v16, 4  ;;  %v229_v41 = vadd.s32 %v228_v37, %v224_v20  ;;  %vm307_vm11 = vcmp.lt.s32.totalorder %v286_v16, 3 }
 0x121   :  { %v304_v43 = vor.u32 %v303_v36, %v302_v31  ;;  %v310_v45 = vsel %vm308_vm10, %v298_v35, 2102212464  ;;  %v289_v46 = vshrl.u32 %v1559_v34, %v288_v17  ;;  %v313_v47 = vsel %vm305_vm9, %v292_v32, %v295_v33 }
 0x122   :  { %v314_v48 = vsel %vm308_vm10, %v301_v39, 920167782  ;;  %v317_v49 = vsel %vm305_vm9, %v295_v33, %v298_v35  ;;  %v230_v50 = vadd.s32 536870912, %v229_v41  ;;  %vm306_vm12 = vcmp.lt.s32.totalorder %v286_v16, 2 }
 0x123   :  { %v315_v52 = vsel %vm307_vm11, %v298_v35, %v314_v48  ;;  %v318_v53 = vsel %vm308_vm10, %v304_v43, 1326507024  ;;  %v309_v54 = vsel %vm305_vm9, %v289_v46, %v292_v32  ;;  %v311_v55 = vsel %vm307_vm11, %v295_v33, %v310_v45 }
 0x124   :  { %v316_v56 = vsel %vm306_vm12, %v313_v47, %v315_v52  ;;  %v319_v57 = vsel %vm307_vm11, %v301_v39, %v318_v53  ;;  %v1722_v58 = vshrl.u32 %v230_v50, 30  ;;  %v312_v2 = vsel %vm306_vm12, %v309_v54, %v311_v55 }
 0x125   :  { %v320_v59 = vsel %vm306_vm12, %v317_v49, %v319_v57  ;;  %v1724_v60 = vmul.u32.u64.low %v321_v18, %v316_v56  ;;  %v1725_v61 = vmul.u32.u64.high %v321_v18, %v316_v56, %v1724_v60  ;;  %v328_v5 = vmul.u32 %v321_v18, %v312_v2 }
 0x126   :  { %v1727_v62 = vmul.u32.u64.low %v321_v18, %v320_v59  ;;  %v1728_v63 = vmul.u32.u64.high %v321_v18, %v320_v59, %v1727_v62  ;;  %v232_v1 = vshll.u32 %v1722_v58, 30  ;;  %v225_v23 = vadd.s32 %v1702_v12, %v1699_v11 }
 0x127   :  { %v331_v4 = vadd.s32 1, %v1725_v61  ;;  %v255_v57 = vsub.s32 4, %v1722_v58  ;;  %vm275_vm3 = vcmp.lt.s32.totalorder %v1670_v19, 0  ;;  %vm274_vm4 = vcmp.le.f32.partialorder %v273_v27, 0.7853982 }
 0x128   :  { %v233_v3 = vsub.s32 %v229_v41, %v232_v1  ;;  %vm330_vm13 = vc.u32 %v1728_v63, %v1724_v60  ;;  %v329_v45 = vadd.s32 %v1724_v60, %v1728_v63  ;;  %vm261_vm8 = vweird.f32 %v1666_v13 }
 0x129   :  { %v332_v7 = vsel %vm330_vm13, %v331_v4, %v1725_v61  ;;  %v256_v15 = vsel %vm171_vm1, %v255_v57, %v1722_v58  ;;  %vm365_vm12 = vweird.f32 %v1670_v19 }
 0x12a   :  { %v235_v6 = vsub.s32 0, %v233_v3  ;;  %v333_v8 = vadd.s32 %v332_v7, %v328_v5  ;;  %v258_v63 = vsel %vm1742_vm2, 0, %v256_v15 }
 0x12b   :  { %v262_v4 = vadd.s32 3, %v258_v63 }
 0x12c   :  { %v1178_v9 = vmin.u32 %v235_v6, %v233_v3  ;;  %v334_v10 = vadd.s32 536870912, %v333_v8 }
 0x12d   :  { %v263_v58 = vand.u32 3, %v262_v4 }
 0x12e   :  { %v237_v14 = vclz %v1178_v9  ;;  %v335_v16 = vshrl.u32 %v334_v10, 30 }
 0x12f   :  { %vm265_vm5 = vcmp.eq.s32.totalorder %v263_v58, 0  ;;  %vm268_vm6 = vcmp.eq.s32.totalorder %v263_v58, 2  ;;  %vm264_vm7 = vcmp.lt.s32.totalorder %v263_v58, 2 }
 0x130   :  { %v1179_v17 = vadd.s32 4294967294, %v237_v14  ;;  %v336_v20 = vshll.u32 %v335_v16, 30  ;;  %v359_v1 = vsub.s32 4, %v335_v16 }
 0x132   :  { %vm1180_vm14 = vcmp.lt.s32.totalorder %v1179_v17, 0  ;;  %v337_v22 = vsub.s32 %v333_v8, %v336_v20  ;;  %v360_v5 = vsel %vm275_vm3, %v359_v1, %v335_v16 }
 0x133   :  { %v240_v21 = vsel %vm1180_vm14, 0, %v1179_v17  ;;  %v362_v8 = vsel %vm274_vm4, 0, %v360_v5 }
 0x134   :  { %v241_v24 = vsub.s32 32, %v240_v21  ;;  %v245_v18 = vsub.s32 4294967266, %v240_v21  ;;  %v339_v25 = vsub.s32 0, %v337_v22  ;;  %v242_v26 = vshll.u32 %v233_v3, %v240_v21 }
 0x135   :  { %v366_v14 = vadd.s32 3, %v362_v8 }
 0x136   :  { %v243_v28 = vshrl.u32 %v225_v23, %v241_v24  ;;  %v246_v29 = vadd.s32 127, %v245_v18  ;;  %v1182_v30 = vmin.u32 %v339_v25, %v337_v22 }
 0x137   :  { %v367_v21 = vand.u32 3, %v366_v14 }
 0x138   :  { %v244_v31 = vor.u32 %v243_v28, %v242_v26  ;;  %v247_v32 = vshll.u32 %v246_v29, 23  ;;  %v341_v33 = vclz %v1182_v30 }
 0x139   :  { %vm372_vm9 = vcmp.eq.s32.totalorder %v367_v21, 2  ;;  %vm369_vm10 = vcmp.eq.s32.totalorder %v367_v21, 0  ;;  %vm368_vm11 = vcmp.lt.s32.totalorder %v367_v21, 2 }
 0x13a   :  { %v248_v35 = vor.u32 4788187, %v247_v32  ;;  %v1183_v36 = vadd.s32 4294967294, %v341_v33  ;;  %v251_v39 = vcvt.s32.f32 %v244_v31 }
 0x13c   :  { %v249_v37 = vand.u32 2147483647, %v248_v35  ;;  %vm1184_vm15 = vcmp.lt.s32.totalorder %v1183_v36, 0 }
 0x13d   :  { %v344_v43 = vsel %vm1184_vm15, 0, %v1183_v36  ;;  %v1382_v36 = vld [vmem:[#allocation8 + $0x38] sm:$0xff]  }
 0x13e   :  { %v252_v41 = vmul.f32 %v251_v39, %v249_v37  ;;  %v345_v11 = vsub.s32 32, %v344_v43  ;;  %v349_v12 = vsub.s32 4294967266, %v344_v43  ;;  %v346_v47 = vshll.u32 %v337_v22, %v344_v43  ;;  %1293 = vmatpush3.bf16.msra.mxu0 %v1382_v36  ;;  %v1383_v37 = vld [vmem:[#allocation8 + $0x30] sm:$0xff]   ;;  %v1384_v39 = vld [vmem:[#allocation8 + $0x28] sm:$0xff]  }
 0x13f   :  { %1294 = vmatprep.subr.bf16.mxu0 %v1557_v0  ;;  %v1388_v43 = vld [vmem:[#allocation8 + $0x8] sm:$0xff]  }
 0x140   :  { %v253_v46 = vxor.u32 2147483648, %v252_v41  ;;  %v347_v48 = vshrl.u32 %v329_v45, %v345_v11  ;;  %v350_v49 = vadd.s32 127, %v349_v12  ;;  %v1389_v45 = vld [vmem:[#allocation8] sm:$0xff]   ;;  %v1185_v11 = vld [vmem:[%s1974_s4] ss:$0 sm:$0xff] }
 0x142   :  { %v254_v50 = vsel %vm171_vm1, %v253_v46, %v252_v41  ;;  %v348_v53 = vor.u32 %v347_v48, %v346_v47  ;;  %v351_v54 = vshll.u32 %v350_v49, 23  ;;  %1295 = vmatpush3.bf16.msra.mxu0 %v1383_v37  ;;  %v1385_v41 = vld [vmem:[#allocation8 + $0x20] sm:$0xff]  }
 0x143   :  { %v257_v55 = vsel %vm1742_vm2, %v1666_v13, %v254_v50  ;;  %1296 = vmatprep.subr.bf16.mxu0 %v1557_v0 }
 0x144   :  { %1398 = vcosq.f32 %v257_v55  ;;  %v352_v56 = vor.u32 4788187, %v351_v54  ;;  %v355_v60 = vcvt.s32.f32 %v348_v53 }
 0x145   :  { %1400 = vsinq.f32 %v257_v55 }
 0x146   :  { %v353_v59 = vand.u32 2147483647, %v352_v56  ;;  %1297 = vmatpush3.bf16.msra.mxu0 %v1384_v39 }
 0x147   :  { %1298 = vmatprep.subr.bf16.mxu0 %v1557_v0 }
 0x148   :  { %v356_v61 = vmul.f32 %v355_v60, %v353_v59 }
 0x14a   :  { %v357_v62 = vxor.u32 2147483648, %v356_v61  ;;  %1299 = vmatpush3.bf16.msra.mxu0 %v1385_v41 }
 0x14b   :  { %1300 = vmatprep.subr.bf16.mxu0 %v1557_v0 }
 0x14c   :  { %v358_v2 = vsel %vm275_vm3, %v357_v62, %v356_v61 }
 0x14d   :  { %v361_v3 = vsel %vm274_vm4, %v1670_v19, %v358_v2 }
 0x14e   :  { %1402 = vcosq.f32 %v361_v3 }
 0x14f   :  { %1404 = vsinq.f32 %v361_v3 }
 0x151   :  { %v1399_v6 = vpop.eup %1398 }
 0x152   :  { %v1401_v7 = vpop.eup %1400  ;;  %v269_v10 = vxor.u32 2147483648, %v1399_v6 }
 0x153   :  { %v266_v9 = vxor.u32 2147483648, %v1401_v7 }
 0x154   :  { %v270_v20 = vsel %vm268_vm6, %v269_v10, %v1401_v7 }
 0x155   :  { %v267_v17 = vsel %vm265_vm5, %v1399_v6, %v266_v9 }
 0x156   :  { %v271_v27 = vsel %vm264_vm7, %v267_v17, %v270_v20 }
 0x157   :  { %v272_v24 = vsel %vm261_vm8, nan, %v271_v27 }
 0x158   :  { %v377_v29 = vmul.f32 %v272_v24, %v272_v24 }
 0x15a   :  { %v379_v32 = vadd.f32 %v377_v29, %v1666_v13  ;;  %v1386_v13 = vld [vmem:[#allocation8 + $0x18] sm:$0xff]  }
 0x15b   :  { %v1403_v22 = vpop.eup %1402  ;;  %1301 = vmatpush3.bf16.msra.mxu0 %v1386_v13 }
 0x15c   :  { %v1405_v23 = vpop.eup %1404  ;;  %v373_v16 = vxor.u32 2147483648, %v1403_v22  ;;  %1302 = vmatprep.subr.bf16.mxu0 %v1557_v0 }
 0x15d   :  { %v370_v18 = vxor.u32 2147483648, %v1405_v23 }
 0x15e   :  { %v374_v25 = vsel %vm372_vm9, %v373_v16, %v1405_v23 }
 0x15f   :  { %v371_v26 = vsel %vm369_vm10, %v1403_v22, %v370_v18 }
 0x160   :  { %v375_v28 = vsel %vm368_vm11, %v371_v26, %v374_v25 }
 0x161   :  { %v376_v30 = vsel %vm365_vm12, nan, %v375_v28 }
 0x162   :  { %v378_v31 = vmul.f32 %v376_v30, %v376_v30 }
 0x164   :  { %v380_v33 = vadd.f32 %v378_v31, %v1670_v19  ;;  %v1387_v19 = vld [vmem:[#allocation8 + $0x10] sm:$0xff]  }
 0x165   :  { %1303 = vmatpush3.bf16.msra.mxu0 %v1387_v19 }
 0x166   :  { %v381_v35 = vpack.c.bf16 %v380_v33, %v379_v32  ;;  %1304 = vmatprep.subr.bf16.mxu0 %v1557_v0 }
 0x168   :  { %1289 = vmatmul.mubr.bf16.vlgmr.msra.gmra.mxu1 %v381_v35 }
 0x169   :  { %1328 = vmatprep.mubr.msk.bf16.mxu1 %vm1558_vm0, %v1557_v0  ;;  %1305 = vmatpush3.bf16.msra.mxu0 %v1388_v43 }
 0x16a   :  { %1306 = vmatprep.subr.bf16.mxu0 %v1557_v0 }
 0x16d   :  { %1307 = vmatpush3.bf16.msra.mxu0 %v1389_v45 }
 0x228   :  { %v487_v12 = vpop.f32.mrf.mxu1 }
 0x229   :  { %v1775_v46 = vadd.f32 %v1185_v11, %v487_v12 }
 0x22a   :  { %v1290_v47 = vpop.f32.mrf.mxu1 }
 0x22b   :  { %v494_v48 = vand.u32 2147483647, %v1775_v46  ;;  %v497_v49 = vand.u32 2139095040, %v1775_v46  ;;  %vm496_vm11 = vcmp.lt.s32.totalorder %v1775_v46, 0 }
 0x22c   :  { %v490_v50 = vpop.f32.mrf.mxu1 }
 0x22d   :  { %v498_v52 = vshrl.u32 %v497_v49, 23  ;;  %v1779_v53 = vadd.f32 %v1185_v11, %v490_v50  ;;  %v501_v54 = vand.u32 8388607, %v494_v48  ;;  %vm1846_vm12 = vcmp.le.f32.partialorder %v494_v48, 0.7853982 }
 0x22e   :  { %v1291_v55 = vpop.f32.mrf.mxu1 }
 0x22f   :  { %v1194_v56 = vadd.s32 4294967169, %v498_v52  ;;  %v601_v57 = vand.u32 2139095040, %v1779_v53  ;;  %v502_v60 = vor.u32 8388608, %v501_v54  ;;  %v598_v15 = vand.u32 2147483647, %v1779_v53 }
 0x231   :  { %v504_v59 = vadd.s32 1, %v1194_v56  ;;  %v602_v61 = vshrl.u32 %v601_v57, 23  ;;  %v1785_v3 = vshll.u32 %v502_v60, 8  ;;  %v605_v6 = vand.u32 8388607, %v598_v15 }
 0x233   :  { %vm505_vm0 = vcmp.gt.s32.totalorder %v504_v59, 0  ;;  %v1198_v63 = vadd.s32 4294967169, %v602_v61  ;;  %v606_v36 = vor.u32 8388608, %v605_v6 }
 0x234   :  { %v506_v62 = vsel %vm505_vm0, %v504_v59, 0  ;;  %vm600_vm0 = vcmp.lt.s32.totalorder %v1779_v53, 0 }
 0x235   :  { %v507_v1 = vshrl.u32 %v506_v62, 5  ;;  %v508_v2 = vand.u32 31, %v506_v62  ;;  %v608_v7 = vadd.s32 1, %v1198_v63  ;;  %v646_v52 = vshll.u32 %v606_v36, 8 }
 0x237   :  { %v509_v4 = vsub.s32 32, %v508_v2  ;;  %v511_v5 = vshll.u32 %v1559_v34, %v508_v2  ;;  %v514_v58 = vshll.u32 %v1560_v38, %v508_v2  ;;  %v517_v8 = vshll.u32 %v1561_v40, %v508_v2 }
 0x238   :  { %v520_v9 = vshll.u32 %v1562_v42, %v508_v2  ;;  %v523_v10 = vshll.u32 %v1563_v44, %v508_v2  ;;  %vm526_vm13 = vcmp.lt.s32.totalorder %v507_v1, 1  ;;  %vm528_vm14 = vcmp.lt.s32.totalorder %v507_v1, 3 }
 0x239   :  { %v512_v14 = vshrl.u32 %v1560_v38, %v509_v4  ;;  %v515_v17 = vshrl.u32 %v1561_v40, %v509_v4  ;;  %v518_v20 = vshrl.u32 %v1562_v42, %v509_v4  ;;  %v510_v21 = vshrl.u32 %v1559_v34, %v509_v4 }
 0x23a   :  { %v521_v27 = vshrl.u32 %v1563_v44, %v509_v4  ;;  %v524_v22 = vshrl.u32 %v1564_v51, %v509_v4  ;;  %vm609_vm15 = vcmp.gt.s32.totalorder %v608_v7, 0  ;;  %vm529_vm1 = vcmp.lt.s32.totalorder %v507_v1, 4 }
 0x23b   :  { %v513_v23 = vor.u32 %v512_v14, %v511_v5  ;;  %v516_v16 = vor.u32 %v515_v17, %v514_v58  ;;  %v519_v24 = vor.u32 %v518_v20, %v517_v8  ;;  %v610_v26 = vsel %vm609_vm15, %v608_v7, 0 }
 0x23c   :  { %v522_v18 = vor.u32 %v521_v27, %v520_v9  ;;  %v525_v25 = vor.u32 %v524_v22, %v523_v10  ;;  %vm527_vm2 = vcmp.lt.s32.totalorder %v507_v1, 2  ;;  %v612_v41 = vand.u32 31, %v610_v26 }
 0x23d   :  { %v530_v28 = vsel %vm526_vm13, %v510_v21, %v513_v23  ;;  %v531_v29 = vsel %vm529_vm1, %v519_v24, 2102212464  ;;  %v534_v30 = vsel %vm526_vm13, %v513_v23, %v516_v16  ;;  %v538_v31 = vsel %vm526_vm13, %v516_v16, %v519_v24 }
 0x23e   :  { %v532_v32 = vsel %vm528_vm14, %v516_v16, %v531_v29  ;;  %v535_v33 = vsel %vm529_vm1, %v522_v18, 920167782  ;;  %v539_v35 = vsel %vm529_vm1, %v525_v25, 1326507024  ;;  %v611_v49 = vshrl.u32 %v610_v26, 5 }
 0x23f   :  { %v536_v37 = vsel %vm528_vm14, %v519_v24, %v535_v33  ;;  %v540_v39 = vsel %vm528_vm14, %v522_v18, %v539_v35  ;;  %v533_v13 = vsel %vm527_vm2, %v530_v28, %v532_v32  ;;  %v613_v50 = vsub.s32 32, %v612_v41 }
 0x240   :  { %v537_v19 = vsel %vm527_vm2, %v534_v30, %v536_v37  ;;  %v541_v43 = vsel %vm527_vm2, %v538_v31, %v540_v39  ;;  %v549_v54 = vmul.u32 %v1785_v3, %v533_v13  ;;  %v615_v55 = vshll.u32 %v1559_v34, %v612_v41 }
 0x241   :  { %v1807_v45 = vmul.u32.u64.low %v1785_v3, %v541_v43  ;;  %v1808_v11 = vmul.u32.u64.high %v1785_v3, %v541_v43, %v1807_v45  ;;  %v1811_v12 = vmul.u32.u64.low %v1785_v3, %v537_v19  ;;  %v1812_v47 = vmul.u32.u64.high %v1785_v3, %v537_v19, %v1811_v12 }
 0x242   :  { %v618_v56 = vshll.u32 %v1560_v38, %v612_v41  ;;  %v621_v57 = vshll.u32 %v1561_v40, %v612_v41  ;;  %v616_v59 = vshrl.u32 %v1560_v38, %v613_v50  ;;  %v619_v60 = vshrl.u32 %v1561_v40, %v613_v50 }
 0x243   :  { %v622_v61 = vshrl.u32 %v1562_v42, %v613_v50  ;;  %v624_v62 = vshll.u32 %v1562_v42, %v612_v41  ;;  %vm551_vm3 = vc.u32 %v1808_v11, %v1811_v12  ;;  %v552_v63 = vadd.s32 1, %v1812_v47 }
 0x244   :  { %v625_v1 = vshrl.u32 %v1563_v44, %v613_v50  ;;  %v627_v2 = vshll.u32 %v1563_v44, %v612_v41  ;;  %v617_v3 = vor.u32 %v616_v59, %v615_v55  ;;  %v620_v4 = vor.u32 %v619_v60, %v618_v56 }
 0x245   :  { %v623_v5 = vor.u32 %v622_v61, %v621_v57  ;;  %v628_v6 = vshrl.u32 %v1564_v51, %v613_v50  ;;  %v553_v7 = vsel %vm551_vm3, %v552_v63, %v1812_v47  ;;  %vm630_vm4 = vcmp.lt.s32.totalorder %v611_v49, 1 }
 0x246   :  { %v626_v58 = vor.u32 %v625_v1, %v624_v62  ;;  %vm633_vm5 = vcmp.lt.s32.totalorder %v611_v49, 4  ;;  %v554_v8 = vadd.s32 %v553_v7, %v549_v54  ;;  %vm632_vm6 = vcmp.lt.s32.totalorder %v611_v49, 3 }
 0x247   :  { %v629_v9 = vor.u32 %v628_v6, %v627_v2  ;;  %v635_v10 = vsel %vm633_vm5, %v623_v5, 2102212464  ;;  %v614_v14 = vshrl.u32 %v1559_v34, %v613_v50  ;;  %v638_v17 = vsel %vm630_vm4, %v617_v3, %v620_v4 }
 0x248   :  { %v639_v20 = vsel %vm633_vm5, %v626_v58, 920167782  ;;  %v642_v21 = vsel %vm630_vm4, %v620_v4, %v623_v5  ;;  %v555_v27 = vadd.s32 536870912, %v554_v8  ;;  %vm631_vm7 = vcmp.lt.s32.totalorder %v611_v49, 2 }
 0x249   :  { %v640_v22 = vsel %vm632_vm6, %v623_v5, %v639_v20  ;;  %v643_v23 = vsel %vm633_vm5, %v629_v9, 1326507024  ;;  %v634_v16 = vsel %vm630_vm4, %v614_v14, %v617_v3  ;;  %v636_v24 = vsel %vm632_vm6, %v620_v4, %v635_v10 }
 0x24a   :  { %v641_v18 = vsel %vm631_vm7, %v638_v17, %v640_v22  ;;  %v644_v25 = vsel %vm632_vm6, %v626_v58, %v643_v23  ;;  %v556_v26 = vshrl.u32 %v555_v27, 30  ;;  %v637_v35 = vsel %vm631_vm7, %v634_v16, %v636_v24 }
 0x24b   :  { %v645_v28 = vsel %vm631_vm7, %v642_v21, %v644_v25  ;;  %v1831_v29 = vmul.u32.u64.low %v646_v52, %v641_v18  ;;  %v1832_v30 = vmul.u32.u64.high %v646_v52, %v641_v18, %v1831_v29  ;;  %v653_v39 = vmul.u32 %v646_v52, %v637_v35 }
 0x24c   :  { %v1834_v31 = vmul.u32.u64.low %v646_v52, %v645_v28  ;;  %v1835_v32 = vmul.u32.u64.high %v646_v52, %v645_v28, %v1834_v31  ;;  %v557_v33 = vshll.u32 %v556_v26, 30  ;;  %v550_v57 = vadd.s32 %v1811_v12, %v1808_v11 }
 0x24d   :  { %v656_v37 = vadd.s32 1, %v1832_v30  ;;  %v580_v18 = vsub.s32 4, %v556_v26  ;;  %vm599_vm13 = vcmp.le.f32.partialorder %v598_v15, 0.7853982  ;;  %vm586_vm2 = vweird.f32 %v1775_v46 }
 0x24e   :  { %v558_v36 = vsub.s32 %v554_v8, %v557_v33  ;;  %vm655_vm8 = vc.u32 %v1835_v32, %v1831_v29  ;;  %v654_v10 = vadd.s32 %v1831_v29, %v1835_v32  ;;  %vm690_vm6 = vweird.f32 %v1779_v53 }
 0x24f   :  { %v657_v13 = vsel %vm655_vm8, %v656_v37, %v1832_v30  ;;  %v581_v30 = vsel %vm496_vm11, %v580_v18, %v556_v26 }
 0x250   :  { %v560_v41 = vsub.s32 0, %v558_v36  ;;  %v658_v19 = vadd.s32 %v657_v13, %v653_v39  ;;  %v583_v33 = vsel %vm1846_vm12, 0, %v581_v30 }
 0x251   :  { %v587_v37 = vadd.s32 3, %v583_v33 }
 0x252   :  { %v1195_v43 = vmin.u32 %v560_v41, %v558_v36  ;;  %v659_v45 = vadd.s32 536870912, %v658_v19 }
 0x253   :  { %v588_v13 = vand.u32 3, %v587_v37 }
 0x254   :  { %v562_v47 = vclz %v1195_v43  ;;  %v660_v49 = vshrl.u32 %v659_v45, 30 }
 0x255   :  { %vm590_vm14 = vcmp.eq.s32.totalorder %v588_v13, 0  ;;  %vm593_vm15 = vcmp.eq.s32.totalorder %v588_v13, 2  ;;  %vm589_vm1 = vcmp.lt.s32.totalorder %v588_v13, 2 }
 0x256   :  { %v1196_v50 = vadd.s32 4294967294, %v562_v47  ;;  %v661_v54 = vshll.u32 %v660_v49, 30  ;;  %v684_v48 = vsub.s32 4, %v660_v49 }
 0x258   :  { %vm1197_vm9 = vcmp.lt.s32.totalorder %v1196_v50, 0  ;;  %v662_v56 = vsub.s32 %v658_v19, %v661_v54  ;;  %v685_v39 = vsel %vm600_vm0, %v684_v48, %v660_v49 }
 0x259   :  { %v565_v55 = vsel %vm1197_vm9, 0, %v1196_v50  ;;  %v687_v19 = vsel %vm599_vm13, 0, %v685_v39 }
 0x25a   :  { %v566_v59 = vsub.s32 32, %v565_v55  ;;  %v570_v52 = vsub.s32 4294967266, %v565_v55  ;;  %v664_v60 = vsub.s32 0, %v662_v56  ;;  %v567_v61 = vshll.u32 %v558_v36, %v565_v55 }
 0x25b   :  { %v691_v47 = vadd.s32 3, %v687_v19 }
 0x25c   :  { %v568_v62 = vshrl.u32 %v550_v57, %v566_v59  ;;  %v571_v63 = vadd.s32 127, %v570_v52  ;;  %v1199_v1 = vmin.u32 %v664_v60, %v662_v56 }
 0x25d   :  { %v692_v15 = vand.u32 3, %v691_v47 }
 0x25e   :  { %v569_v2 = vor.u32 %v568_v62, %v567_v61  ;;  %v572_v3 = vshll.u32 %v571_v63, 23  ;;  %v666_v4 = vclz %v1199_v1 }
 0x25f   :  { %vm697_vm3 = vcmp.eq.s32.totalorder %v692_v15, 2  ;;  %vm694_vm4 = vcmp.eq.s32.totalorder %v692_v15, 0  ;;  %vm693_vm5 = vcmp.lt.s32.totalorder %v692_v15, 2 }
 0x260   :  { %v573_v5 = vor.u32 4788187, %v572_v3  ;;  %v1200_v6 = vadd.s32 4294967294, %v666_v4  ;;  %v576_v58 = vcvt.s32.f32 %v569_v2 }
 0x262   :  { %v574_v7 = vand.u32 2147483647, %v573_v5  ;;  %vm1201_vm10 = vcmp.lt.s32.totalorder %v1200_v6, 0 }
 0x263   :  { %v669_v9 = vsel %vm1201_vm10, 0, %v1200_v6  ;;  %v1390_v6 = vld [vmem:[#allocation10 + $0x38] sm:$0xff]  }
 0x264   :  { %v577_v8 = vmul.f32 %v576_v58, %v574_v7  ;;  %v670_v11 = vsub.s32 32, %v669_v9  ;;  %v674_v12 = vsub.s32 4294967266, %v669_v9  ;;  %v671_v17 = vshll.u32 %v662_v56, %v669_v9  ;;  %1313 = vmatpush3.bf16.msra.mxu1 %v1390_v6  ;;  %v1391_v7 = vld [vmem:[#allocation10 + $0x30] sm:$0xff]   ;;  %v1392_v58 = vld [vmem:[#allocation10 + $0x28] sm:$0xff]   ;;  %v1394_v9 = vld [vmem:[#allocation10 + $0x18] sm:$0xff]  }
 0x265   :  { %1314 = vmatprep.subr.bf16.mxu1 %v1557_v0 }
 0x266   :  { %v578_v14 = vxor.u32 2147483648, %v577_v8  ;;  %v672_v20 = vshrl.u32 %v654_v10, %v670_v11  ;;  %v675_v21 = vadd.s32 127, %v674_v12  ;;  %v1397_v10 = vld [vmem:[#allocation10] sm:$0xff]   ;;  %v1202_v11 = vld [vmem:[%s1976_s6] ss:$0 sm:$0xff] }
 0x268   :  { %v579_v22 = vsel %vm496_vm11, %v578_v14, %v577_v8  ;;  %v673_v16 = vor.u32 %v672_v20, %v671_v17  ;;  %v676_v24 = vshll.u32 %v675_v21, 23  ;;  %1315 = vmatpush3.bf16.msra.mxu1 %v1391_v7  ;;  %v1393_v8 = vld [vmem:[#allocation10 + $0x20] sm:$0xff]  }
 0x269   :  { %v582_v23 = vsel %vm1846_vm12, %v1775_v46, %v579_v22  ;;  %1316 = vmatprep.subr.bf16.mxu1 %v1557_v0 }
 0x26a   :  { %1406 = vcosq.f32 %v582_v23  ;;  %v677_v25 = vor.u32 4788187, %v676_v24  ;;  %v680_v29 = vcvt.s32.f32 %v673_v16 }
 0x26b   :  { %1408 = vsinq.f32 %v582_v23 }
 0x26c   :  { %v678_v28 = vand.u32 2147483647, %v677_v25  ;;  %1317 = vmatpush3.bf16.msra.mxu1 %v1392_v58 }
 0x26d   :  { %1318 = vmatprep.subr.bf16.mxu1 %v1557_v0 }
 0x26e   :  { %v681_v31 = vmul.f32 %v680_v29, %v678_v28 }
 0x270   :  { %v682_v32 = vxor.u32 2147483648, %v681_v31  ;;  %1319 = vmatpush3.bf16.msra.mxu1 %v1393_v8 }
 0x271   :  { %1320 = vmatprep.subr.bf16.mxu1 %v1557_v0 }
 0x272   :  { %v683_v35 = vsel %vm600_vm0, %v682_v32, %v681_v31 }
 0x273   :  { %v686_v36 = vsel %vm599_vm13, %v1779_v53, %v683_v35 }
 0x274   :  { %1410 = vcosq.f32 %v686_v36  ;;  %1321 = vmatpush3.bf16.msra.mxu1 %v1394_v9 }
 0x275   :  { %1412 = vsinq.f32 %v686_v36  ;;  %1322 = vmatprep.subr.bf16.mxu1 %v1557_v0 }
 0x277   :  { %v1407_v41 = vpop.eup %1406 }
 0x278   :  { %v1409_v26 = vpop.eup %1408  ;;  %v594_v45 = vxor.u32 2147483648, %v1407_v41 }
 0x279   :  { %v591_v43 = vxor.u32 2147483648, %v1409_v26 }
 0x27a   :  { %v595_v54 = vsel %vm593_vm15, %v594_v45, %v1409_v26 }
 0x27b   :  { %v592_v50 = vsel %vm590_vm14, %v1407_v41, %v591_v43 }
 0x27c   :  { %v596_v55 = vsel %vm589_vm1, %v592_v50, %v595_v54 }
 0x27d   :  { %v597_v59 = vsel %vm586_vm2, nan, %v596_v55 }
 0x27e   :  { %v702_v63 = vmul.f32 %v597_v59, %v597_v59 }
 0x280   :  { %v704_v3 = vadd.f32 %v702_v63, %v1775_v46  ;;  %v1395_v46 = vld [vmem:[#allocation10 + $0x10] sm:$0xff]  }
 0x281   :  { %v1411_v56 = vpop.eup %1410  ;;  %1323 = vmatpush3.bf16.msra.mxu1 %v1395_v46 }
 0x282   :  { %v1413_v57 = vpop.eup %1412  ;;  %v698_v49 = vxor.u32 2147483648, %v1411_v56  ;;  %1324 = vmatprep.subr.bf16.mxu1 %v1557_v0 }
 0x283   :  { %v695_v52 = vxor.u32 2147483648, %v1413_v57 }
 0x284   :  { %v699_v60 = vsel %vm697_vm3, %v698_v49, %v1413_v57 }
 0x285   :  { %v696_v61 = vsel %vm694_vm4, %v1411_v56, %v695_v52 }
 0x286   :  { %v700_v62 = vsel %vm693_vm5, %v696_v61, %v699_v60 }
 0x287   :  { %v701_v1 = vsel %vm690_vm6, nan, %v700_v62 }
 0x288   :  { %v703_v2 = vmul.f32 %v701_v1, %v701_v1 }
 0x28a   :  { %v705_v4 = vadd.f32 %v703_v2, %v1779_v53  ;;  %v1396_v53 = vld [vmem:[#allocation10 + $0x8] sm:$0xff]  }
 0x28b   :  { %1325 = vmatpush3.bf16.msra.mxu1 %v1396_v53 }
 0x28c   :  { %v706_v5 = vpack.c.bf16 %v705_v4, %v704_v3  ;;  %1326 = vmatprep.subr.bf16.mxu1 %v1557_v0 }
 0x28e   :  { %1309 = vmatmul.mubr.bf16.vlgmr.msra.gmra.mxu0 %v706_v5 }
 0x28f   :  { %1327 = vmatpush3.bf16.msra.mxu1 %v1397_v10 }
 0x34e   :  { %v812_v12 = vpop.f32.mrf.mxu0 }
 0x34f   :  { %v1873_v14 = vadd.f32 %v1202_v11, %v812_v12 }
 0x350   :  { %v1310_v17 = vpop.f32.mrf.mxu0 }
 0x351   :  { %v819_v20 = vand.u32 2147483647, %v1873_v14  ;;  %v822_v21 = vand.u32 2139095040, %v1873_v14  ;;  %vm821_vm5 = vcmp.lt.s32.totalorder %v1873_v14, 0 }
 0x352   :  { %v815_v27 = vpop.f32.mrf.mxu0 }
 0x353   :  { %v823_v22 = vshrl.u32 %v822_v21, 23  ;;  %v1877_v23 = vadd.f32 %v1202_v11, %v815_v27  ;;  %v826_v0 = vand.u32 8388607, %v819_v20  ;;  %vm1944_vm6 = vcmp.le.f32.partialorder %v819_v20, 0.7853982 }
 0x354   :  { %v1311_v16 = vpop.f32.mrf.mxu0 }
 0x355   :  { %v1211_v24 = vadd.s32 4294967169, %v823_v22  ;;  %v926_v18 = vand.u32 2139095040, %v1877_v23  ;;  %v827_v28 = vor.u32 8388608, %v826_v0  ;;  %v923_v30 = vand.u32 2147483647, %v1877_v23 }
 0x357   :  { %v829_v25 = vadd.s32 1, %v1211_v24  ;;  %v927_v29 = vshrl.u32 %v926_v18, 23  ;;  %v1883_v35 = vshll.u32 %v827_v28, 8  ;;  %v930_v39 = vand.u32 8388607, %v923_v30 }
 0x359   :  { %vm830_vm7 = vcmp.gt.s32.totalorder %v829_v25, 0  ;;  %v1215_v32 = vadd.s32 4294967169, %v927_v29  ;;  %v931_v5 = vor.u32 8388608, %v930_v39 }
 0x35a   :  { %v831_v31 = vsel %vm830_vm7, %v829_v25, 0  ;;  %vm925_vm7 = vcmp.lt.s32.totalorder %v1877_v23, 0 }
 0x35b   :  { %v832_v48 = vshrl.u32 %v831_v31, 5  ;;  %v833_v33 = vand.u32 31, %v831_v31  ;;  %v933_v41 = vadd.s32 1, %v1215_v32  ;;  %v971_v27 = vshll.u32 %v931_v5, 8 }
 0x35d   :  { %v834_v36 = vsub.s32 32, %v833_v33  ;;  %v836_v37 = vshll.u32 %v1559_v34, %v833_v33  ;;  %v839_v26 = vshll.u32 %v1560_v38, %v833_v33  ;;  %v842_v13 = vshll.u32 %v1561_v40, %v833_v33 }
 0x35e   :  { %v845_v19 = vshll.u32 %v1562_v42, %v833_v33  ;;  %v848_v43 = vshll.u32 %v1563_v44, %v833_v33  ;;  %vm851_vm8 = vcmp.lt.s32.totalorder %v832_v48, 1  ;;  %vm853_vm9 = vcmp.lt.s32.totalorder %v832_v48, 3 }
 0x35f   :  { %v837_v45 = vshrl.u32 %v1560_v38, %v834_v36  ;;  %v840_v47 = vshrl.u32 %v1561_v40, %v834_v36  ;;  %v843_v50 = vshrl.u32 %v1562_v42, %v834_v36  ;;  %v835_v54 = vshrl.u32 %v1559_v34, %v834_v36 }
 0x360   :  { %v846_v15 = vshrl.u32 %v1563_v44, %v834_v36  ;;  %v849_v55 = vshrl.u32 %v1564_v51, %v834_v36  ;;  %vm934_vm10 = vcmp.gt.s32.totalorder %v933_v41, 0  ;;  %vm854_vm11 = vcmp.lt.s32.totalorder %v832_v48, 4 }
 0x361   :  { %v838_v56 = vor.u32 %v837_v45, %v836_v37  ;;  %v841_v57 = vor.u32 %v840_v47, %v839_v26  ;;  %v844_v49 = vor.u32 %v843_v50, %v842_v13  ;;  %v935_v60 = vsel %vm934_vm10, %v933_v41, 0 }
 0x362   :  { %v847_v59 = vor.u32 %v846_v15, %v845_v19  ;;  %v850_v52 = vor.u32 %v849_v55, %v848_v43  ;;  %vm852_vm12 = vcmp.lt.s32.totalorder %v832_v48, 2  ;;  %v937_v58 = vand.u32 31, %v935_v60 }
 0x363   :  { %v855_v61 = vsel %vm851_vm8, %v835_v54, %v838_v56  ;;  %v856_v62 = vsel %vm854_vm11, %v844_v49, 2102212464  ;;  %v859_v63 = vsel %vm851_vm8, %v838_v56, %v841_v57  ;;  %v863_v1 = vsel %vm851_vm8, %v841_v57, %v844_v49 }
 0x364   :  { %v857_v2 = vsel %vm853_vm9, %v841_v57, %v856_v62  ;;  %v860_v3 = vsel %vm854_vm11, %v847_v59, 920167782  ;;  %v864_v4 = vsel %vm854_vm11, %v850_v52, 1326507024  ;;  %v936_v17 = vshrl.u32 %v935_v60, 5 }
 0x365   :  { %v861_v6 = vsel %vm853_vm9, %v844_v49, %v860_v3  ;;  %v865_v7 = vsel %vm853_vm9, %v847_v59, %v864_v4  ;;  %v858_v8 = vsel %vm852_vm12, %v855_v61, %v857_v2  ;;  %v938_v21 = vsub.s32 32, %v937_v58 }
 0x366   :  { %v862_v9 = vsel %vm852_vm12, %v859_v63, %v861_v6  ;;  %v866_v46 = vsel %vm852_vm12, %v863_v1, %v865_v7  ;;  %v874_v22 = vmul.u32 %v1883_v35, %v858_v8  ;;  %v940_v0 = vshll.u32 %v1559_v34, %v937_v58 }
 0x367   :  { %v1905_v53 = vmul.u32.u64.low %v1883_v35, %v866_v46  ;;  %v1906_v10 = vmul.u32.u64.high %v1883_v35, %v866_v46, %v1905_v53  ;;  %v1909_v11 = vmul.u32.u64.low %v1883_v35, %v862_v9  ;;  %v1910_v12 = vmul.u32.u64.high %v1883_v35, %v862_v9, %v1909_v11 }
 0x368   :  { %v943_v16 = vshll.u32 %v1560_v38, %v937_v58  ;;  %v946_v24 = vshll.u32 %v1561_v40, %v937_v58  ;;  %v941_v18 = vshrl.u32 %v1560_v38, %v938_v21  ;;  %v944_v25 = vshrl.u32 %v1561_v40, %v938_v21 }
 0x369   :  { %v947_v28 = vshrl.u32 %v1562_v42, %v938_v21  ;;  %v949_v29 = vshll.u32 %v1562_v42, %v937_v58  ;;  %vm876_vm0 = vc.u32 %v1906_v10, %v1909_v11  ;;  %v877_v31 = vadd.s32 1, %v1910_v12 }
 0x36a   :  { %v950_v32 = vshrl.u32 %v1563_v44, %v938_v21  ;;  %v952_v48 = vshll.u32 %v1563_v44, %v937_v58  ;;  %v942_v33 = vor.u32 %v941_v18, %v940_v0  ;;  %v945_v35 = vor.u32 %v944_v25, %v943_v16 }
 0x36b   :  { %v948_v36 = vor.u32 %v947_v28, %v946_v24  ;;  %v953_v38 = vshrl.u32 %v1564_v51, %v938_v21  ;;  %v878_v40 = vsel %vm876_vm0, %v877_v31, %v1910_v12  ;;  %vm955_vm13 = vcmp.lt.s32.totalorder %v936_v17, 1 }
 0x36c   :  { %v951_v37 = vor.u32 %v950_v32, %v949_v29  ;;  %vm958_vm14 = vcmp.lt.s32.totalorder %v936_v17, 4  ;;  %v879_v42 = vadd.s32 %v878_v40, %v874_v22  ;;  %vm957_vm15 = vcmp.lt.s32.totalorder %v936_v17, 3 }
 0x36d   :  { %v954_v39 = vor.u32 %v953_v38, %v952_v48  ;;  %v960_v41 = vsel %vm958_vm14, %v948_v36, 2102212464  ;;  %v939_v26 = vshrl.u32 %v1559_v34, %v938_v21  ;;  %v963_v13 = vsel %vm955_vm13, %v942_v33, %v945_v35 }
 0x36e   :  { %v964_v19 = vsel %vm958_vm14, %v951_v37, 920167782  ;;  %v967_v43 = vsel %vm955_vm13, %v945_v35, %v948_v36  ;;  %v880_v44 = vadd.s32 536870912, %v879_v42  ;;  %vm956_vm1 = vcmp.lt.s32.totalorder %v936_v17, 2 }
 0x36f   :  { %v965_v45 = vsel %vm957_vm15, %v948_v36, %v964_v19  ;;  %v968_v47 = vsel %vm958_vm14, %v954_v39, 1326507024  ;;  %v959_v50 = vsel %vm955_vm13, %v939_v26, %v942_v33  ;;  %v961_v51 = vsel %vm957_vm15, %v945_v35, %v960_v41 }
 0x370   :  { %v966_v54 = vsel %vm956_vm1, %v963_v13, %v965_v45  ;;  %v969_v15 = vsel %vm957_vm15, %v951_v37, %v968_v47  ;;  %v881_v55 = vshrl.u32 %v880_v44, 30  ;;  %v962_v60 = vsel %vm956_vm1, %v959_v50, %v961_v51 }
 0x371   :  { %v970_v56 = vsel %vm956_vm1, %v967_v43, %v969_v15  ;;  %v1929_v57 = vmul.u32.u64.low %v971_v27, %v966_v54  ;;  %v1930_v49 = vmul.u32.u64.high %v971_v27, %v966_v54, %v1929_v57  ;;  %v978_v63 = vmul.u32 %v971_v27, %v962_v60 }
 0x372   :  { %v1932_v59 = vmul.u32.u64.low %v971_v27, %v970_v56  ;;  %v1933_v52 = vmul.u32.u64.high %v971_v27, %v970_v56, %v1932_v59  ;;  %v882_v34 = vshll.u32 %v881_v55, 30  ;;  %v875_v53 = vadd.s32 %v1909_v11, %v1906_v10 }
 0x373   :  { %v981_v62 = vadd.s32 1, %v1930_v49  ;;  %v905_v19 = vsub.s32 4, %v881_v55  ;;  %vm924_vm8 = vcmp.le.f32.partialorder %v923_v30, 0.7853982  ;;  %vm911_vm12 = vweird.f32 %v1873_v14 }
 0x374   :  { %v883_v61 = vsub.s32 %v879_v42, %v882_v34  ;;  %vm980_vm2 = vc.u32 %v1933_v52, %v1929_v57  ;;  %v979_v35 = vadd.s32 %v1929_v57, %v1933_v52  ;;  %vm1015_vm15 = vweird.f32 %v1877_v23 }
 0x375   :  { %v982_v2 = vsel %vm980_vm2, %v981_v62, %v1930_v49  ;;  %v906_v47 = vsel %vm821_vm5, %v905_v19, %v881_v55 }
 0x376   :  { %v885_v1 = vsub.s32 0, %v883_v61  ;;  %v983_v3 = vadd.s32 %v982_v2, %v978_v63  ;;  %v908_v54 = vsel %vm1944_vm6, 0, %v906_v47 }
 0x377   :  { %v912_v57 = vadd.s32 3, %v908_v54 }
 0x378   :  { %v1212_v4 = vmin.u32 %v885_v1, %v883_v61  ;;  %v984_v5 = vadd.s32 536870912, %v983_v3 }
 0x379   :  { %v913_v52 = vand.u32 3, %v912_v57 }
 0x37a   :  { %v887_v6 = vclz %v1212_v4  ;;  %v985_v7 = vshrl.u32 %v984_v5, 30 }
 0x37b   :  { %vm915_vm9 = vcmp.eq.s32.totalorder %v913_v52, 0  ;;  %vm918_vm10 = vcmp.eq.s32.totalorder %v913_v52, 2  ;;  %vm914_vm11 = vcmp.lt.s32.totalorder %v913_v52, 2 }
 0x37c   :  { %v1213_v58 = vadd.s32 4294967294, %v887_v6  ;;  %v986_v8 = vshll.u32 %v985_v7, 30  ;;  %v1009_v20 = vsub.s32 4, %v985_v7 }
 0x37e   :  { %vm1214_vm3 = vcmp.lt.s32.totalorder %v1213_v58, 0  ;;  %v987_v46 = vsub.s32 %v983_v3, %v986_v8  ;;  %v1010_v49 = vsel %vm925_vm7, %v1009_v20, %v985_v7 }
 0x37f   :  { %v890_v9 = vsel %vm1214_vm3, 0, %v1213_v58  ;;  %v1012_v34 = vsel %vm924_vm8, 0, %v1010_v49 }
 0x380   :  { %v891_v12 = vsub.s32 32, %v890_v9  ;;  %v895_v17 = vsub.s32 4294967266, %v890_v9  ;;  %v989_v21 = vsub.s32 0, %v987_v46  ;;  %v892_v27 = vshll.u32 %v883_v61, %v890_v9 }
 0x381   :  { %v1016_v62 = vadd.s32 3, %v1012_v34 }
 0x382   :  { %v893_v22 = vshrl.u32 %v875_v53, %v891_v12  ;;  %v896_v0 = vadd.s32 127, %v895_v17  ;;  %v1216_v16 = vmin.u32 %v989_v21, %v987_v46 }
 0x383   :  { %v1017_v30 = vand.u32 3, %v1016_v62 }
 0x384   :  { %v894_v24 = vor.u32 %v893_v22, %v892_v27  ;;  %v897_v18 = vshll.u32 %v896_v0, 23  ;;  %v991_v25 = vclz %v1216_v16  ;;  %v1219_v0 = vld [vmem:[%s1978_s8] ss:$0 sm:$0xff] }
 0x385   :  { %vm1022_vm0 = vcmp.eq.s32.totalorder %v1017_v30, 2  ;;  %vm1019_vm13 = vcmp.eq.s32.totalorder %v1017_v30, 0  ;;  %vm1018_vm14 = vcmp.lt.s32.totalorder %v1017_v30, 2 }
 0x386   :  { %v898_v28 = vor.u32 4788187, %v897_v18  ;;  %v1217_v29 = vadd.s32 4294967294, %v991_v25  ;;  %v901_v32 = vcvt.s32.f32 %v894_v24 }
 0x388   :  { %v899_v31 = vand.u32 2147483647, %v898_v28  ;;  %vm1218_vm4 = vcmp.lt.s32.totalorder %v1217_v29, 0 }
 0x389   :  { %v994_v33 = vsel %vm1218_vm4, 0, %v1217_v29 }
 0x38a   :  { %v902_v48 = vmul.f32 %v901_v32, %v899_v31  ;;  %v995_v10 = vsub.s32 32, %v994_v33  ;;  %v999_v11 = vsub.s32 4294967266, %v994_v33  ;;  %v996_v38 = vshll.u32 %v987_v46, %v994_v33 }
 0x38c   :  { %v903_v36 = vxor.u32 2147483648, %v902_v48  ;;  %v997_v40 = vshrl.u32 %v979_v35, %v995_v10  ;;  %v1000_v37 = vadd.s32 127, %v999_v11 }
 0x38e   :  { %v904_v39 = vsel %vm821_vm5, %v903_v36, %v902_v48  ;;  %v998_v26 = vor.u32 %v997_v40, %v996_v38  ;;  %v1001_v13 = vshll.u32 %v1000_v37, 23 }
 0x38f   :  { %v907_v41 = vsel %vm1944_vm6, %v1873_v14, %v904_v39 }
 0x390   :  { %1414 = vcosq.f32 %v907_v41  ;;  %v1002_v43 = vor.u32 4788187, %v1001_v13  ;;  %v1005_v45 = vcvt.s32.f32 %v998_v26 }
 0x391   :  { %1416 = vsinq.f32 %v907_v41 }
 0x392   :  { %v1003_v44 = vand.u32 2147483647, %v1002_v43 }
 0x394   :  { %v1006_v50 = vmul.f32 %v1005_v45, %v1003_v44 }
 0x396   :  { %v1007_v51 = vxor.u32 2147483648, %v1006_v50 }
 0x398   :  { %v1008_v15 = vsel %vm925_vm7, %v1007_v51, %v1006_v50 }
 0x399   :  { %v1011_v56 = vsel %vm924_vm8, %v1877_v23, %v1008_v15 }
 0x39a   :  { %1418 = vcosq.f32 %v1011_v56 }
 0x39b   :  { %1420 = vsinq.f32 %v1011_v56 }
 0x39d   :  { %v1415_v59 = vpop.eup %1414 }
 0x39e   :  { %v1417_v55 = vpop.eup %1416  ;;  %v919_v61 = vxor.u32 2147483648, %v1415_v59 }
 0x39f   :  { %v916_v60 = vxor.u32 2147483648, %v1417_v55 }
 0x3a0   :  { %v920_v1 = vsel %vm918_vm10, %v919_v61, %v1417_v55 }
 0x3a1   :  { %v917_v63 = vsel %vm915_vm9, %v1415_v59, %v916_v60 }
 0x3a2   :  { %v921_v2 = vsel %vm914_vm11, %v917_v63, %v920_v1 }
 0x3a3   :  { %v922_v6 = vsel %vm911_vm12, nan, %v921_v2 }
 0x3a4   :  { %v1027_v46 = vmul.f32 %v922_v6, %v922_v6 }
 0x3a6   :  { %v1029_v17 = vadd.f32 %v1027_v46, %v1873_v14 }
 0x3a7   :  { %v1419_v3 = vpop.eup %1418 }
 0x3a8   :  { %v1421_v4 = vpop.eup %1420  ;;  %v1023_v5 = vxor.u32 2147483648, %v1419_v3 }
 0x3a9   :  { %v1020_v7 = vxor.u32 2147483648, %v1421_v4 }
 0x3aa   :  { %v1024_v58 = vsel %vm1022_vm0, %v1023_v5, %v1421_v4 }
 0x3ab   :  { %v1021_v8 = vsel %vm1019_vm13, %v1419_v3, %v1020_v7 }
 0x3ac   :  { %v1025_v9 = vsel %vm1018_vm14, %v1021_v8, %v1024_v58 }
 0x3ad   :  { %v1026_v53 = vsel %vm1015_vm15, nan, %v1025_v9 }
 0x3ae   :  { %v1028_v12 = vmul.f32 %v1026_v53, %v1026_v53 }
 0x3b0   :  { %v1030_v21 = vadd.f32 %v1028_v12, %v1877_v23 }
 0x3b2   :  { %v1031_v27 = vpack.c.bf16 %v1030_v21, %v1029_v17 }
 0x3b4   :  { %1329 = vmatmul.mubr.bf16.vlgmr.msra.gmra.mxu1 %v1031_v27 }
 0x474   :  { %v1137_v22 = vpop.f32.mrf.mxu1 }
 0x475   :  { %v1138_v18 = vadd.f32 %v1219_v0, %v1137_v22 }
 0x476   :  { %v1330_v16 = vpop.f32.mrf.mxu1 }
 0x478   :  { %v1140_v24 = vpop.f32.mrf.mxu1 }
 0x479   :  { %v1141_v25 = vadd.f32 %v1219_v0, %v1140_v24 }
 0x47a   :  { %v1331_v28 = vpop.f32.mrf.mxu1 }
 0x47b   :  { %v1235_v29 = vpack.c.bf16 %v1141_v25, %v1138_v18 }
 0x47d   :  { %1236 = vst [vmem:[#allocation11] sm:$0xff] %v1235_v29  }
 0x47e   :  { %1533 = shalt.err (!%p1530_p1)
}
 0x47f   :  { %1165 = dma.vmem_to_hbm [thread:$0]  %s1160_s18, 128, %s1979_s9, [#allocation4], %s1552_s14, %s1552_s14, %s1553_s15  }
 0x480   :  { %1548 = dma.done.wait [#allocation4], 128  }
 0x481   :  { %1549 = vsyncadd [#allocation4], 4294967168 }
 0x482   :  { %1169 = vsyncpa [#allocation3], 1 }
 0x483   :  { %1170 = vsyncpa [#allocation6], 1 }
 0x484   :  { %1171 = vsyncpa [#allocation9], 1 }
 0x485   :  { %1172 = vsyncpa [#allocation4], 1 }

</bundles_post_ra>
